<compile_context>
chip_gen: v6e
topology: v6e:2x2x1
jax: 0.10.0
libtpu: 0.0.40
codegen_flags: <defaults>
</compile_context>

<pallas_src>
import jax
import jax.numpy as jnp
from jax.experimental import pallas as pl
from jax.experimental.pallas import tpu as pltpu

EPS = 1e-5  # nn.BatchNorm2d default eps


# ----------------------------- layer bookkeeping --------------------------- #
def layer_plan(in_channel, out_channels, bn):
    """(cin, cout) of every folded 1x1 conv layer + final channel count."""
    layers = [(in_channel, out_channels[-1])]            # first CBa
    c = out_channels[-1]
    for _ in range(bn):                                  # each DensUnit
        layers.append((c, out_channels[0]))
        layers.append((out_channels[0], out_channels[1]))
        c = c + out_channels[1]                          # torch.cat(x, y) along C
    return layers, c


# ------------------------------- Pallas kernel ------------------------------ #
def make_densblock_kernel(layers, bn, small_cin_on_vpu=True):
    """Fused kernel for one (channels, TM) tile.

    Kernel args: x_ref (C_in, TM), w_ref (sum_cout, max_cin), b_ref (sum_cout, 1),
    out_ref (C_out, TM).  All weight/bias slab slices below are static.
    """
    row_off = []                                         # static row offsets per layer
    off = 0
    for (_, cout) in layers:
        row_off.append(off)
        off += cout

    def cba(li, h, w_ref, b_ref):
        cin, cout = layers[li]
        r = row_off[li]
        b = b_ref[r:r + cout, :]                         # (cout, 1)
        if small_cin_on_vpu and cin <= 8:
            # VPU path: cin broadcast multiply-adds per (cout, TM) tile.
            # Keeps the vector-extended (MXU push) slot free for the cin=16 layer.
            acc = jnp.broadcast_to(b, (cout, h.shape[-1]))
            for k in range(cin):                         # static unroll (cin <= 8)
                acc = acc + w_ref[r:r + cout, k:k + 1] * h[k:k + 1, :]
            y = acc
        else:
            w = w_ref[r:r + cout, :cin]                  # (cout, cin) static slice
            y = jnp.dot(w, h, preferred_element_type=jnp.float32) + b
        return jnp.maximum(y, 0.0)                       # act = ReLU

    def kernel(x_ref, w_ref, b_ref, out_ref):
        x = x_ref[...].astype(jnp.float32)
        pieces = [cba(0, x, w_ref, b_ref)]               # first CBa output, (8, TM)
        li = 1
        for _ in range(bn):                              # DensUnits
            # unit input = torch.cat of everything so far (live values; each
            # piece is an exact multiple of (8,128) tiles -> layout-only concat)
            h = pieces[0] if len(pieces) == 1 else jnp.concatenate(pieces, axis=0)
            t = cba(li, h, w_ref, b_ref); li += 1
            y = cba(li, t, w_ref, b_ref); li += 1
            pieces.append(y)
        # [CBa0 | unit1 | ... | unit_bn] == the torch.cat chain; one dense store.
        out_ref[...] = jnp.concatenate(pieces, axis=0).astype(out_ref.dtype)

    return kernel


# -------------------------------- parameters -------------------------------- #
def init_raw_params(key, layers):
    """Deterministic Conv2d(1x1) + BatchNorm2d parameters (inference-mode stats)."""
    raw = []
    for (cin, cout) in layers:
        key, k0, k1, k2, k3, k4, k5 = jax.random.split(key, 7)
        w = jax.random.normal(k0, (cout, cin), jnp.float32) * 0.2     # conv weight (1x1)
        b = jax.random.normal(k1, (cout,), jnp.float32) * 0.1         # conv bias
        gamma = jax.random.uniform(k2, (cout,), jnp.float32, 0.5, 1.5)
        beta = jax.random.normal(k3, (cout,), jnp.float32) * 0.1
        mean = jax.random.normal(k4, (cout,), jnp.float32) * 0.1      # running_mean
        var = jax.random.uniform(k5, (cout,), jnp.float32, 0.5, 1.5)  # running_var
        raw.append((w, b, gamma, beta, mean, var))
    return raw


def fold_and_pack_params(raw, layers):
    """Fold Conv2d(1x1) bias + BatchNorm2d (eval) and pack into single slabs."""
    sum_cout = sum(c for (_, c) in layers)
    max_cin = max(c for (c, _) in layers)
    w_slab = jnp.zeros((sum_cout, max_cin), jnp.float32)
    b_slab = jnp.zeros((sum_cout, 1), jnp.float32)
    off = 0
    for (w, b, gamma, beta, mean, var), (cin, cout) in zip(raw, layers):
        scale = gamma / jnp.sqrt(var + EPS)
        w_eff = w * scale[:, None]                       # (cout, cin): y = W_eff @ h
        b_eff = (b - mean) * scale + beta                # (cout,)
        w_slab = w_slab.at[off:off + cout, :cin].set(w_eff)
        b_slab = b_slab.at[off:off + cout, 0].set(b_eff)
        off += cout
    return w_slab, b_slab


# ------------------------------ pallas wrapper ------------------------------ #
def _round_up(x, m):
    return ((x + m - 1) // m) * m


def _pick_row_tile(hw, n, cap=16384, min_tile=1024):
    """Large lane-dense tile; shrink only to keep enough grid steps (v7x)."""
    tm = min(cap, _round_up(hw, 128))
    # keep >= ~4 grid steps per TensorCore on v7x (2 TCs, both axes parallel)
    while tm > min_tile and n * (-(-hw // tm)) < 8:
        tm = _round_up(tm // 2, 128)
    return tm


def densblock_pallas(x_nchw, w_slab, b_slab, layers, bn, c_out,
                     tm=None, out_dtype=jnp.float32, small_cin_on_vpu=True):
    N, C, H, W = x_nchw.shape
    HW = H * W
    x3d = x_nchw.reshape(N, C, HW)                       # free: no transpose
    if tm is None:
        tm = _pick_row_tile(HW, N)
    grid = (N, pl.cdiv(HW, tm))                          # padded partial last tile is OK:
                                                         # each output column depends only
                                                         # on its own input column.
    out = pl.pallas_call(
        make_densblock_kernel(layers, bn, small_cin_on_vpu),
        out_shape=jax.ShapeDtypeStruct((N, c_out, HW), out_dtype),
        grid_spec=pltpu.PrefetchScalarGridSpec(
            num_scalar_prefetch=0,
            grid=grid,
            in_specs=[
                pl.BlockSpec((None, C, tm), lambda n, i: (n, 0, i)),
                pl.BlockSpec(w_slab.shape, lambda n, i: (0, 0)),
                pl.BlockSpec(b_slab.shape, lambda n, i: (0, 0)),
            ],
            out_specs=pl.BlockSpec((None, c_out, tm), lambda n, i: (n, 0, i)),
        ),
        compiler_params=pltpu.CompilerParams(
            dimension_semantics=("parallel", "parallel")),
    )(x3d, w_slab, b_slab)
    return out.reshape(N, c_out, H, W)                   # free: no transpose


# ------------------------------- plain-JAX ref ------------------------------ #
def densblock_ref(x_nchw, raw, bn):
    N, C, H, W = x_nchw.shape
    h = jnp.transpose(x_nchw, (0, 2, 3, 1)).reshape(N * H * W, C)

    def cba(h, p):
        w, b, gamma, beta, mean, var = p
        y = h @ w.T + b                                           # Conv2d 1x1
        y = (y - mean) / jnp.sqrt(var + EPS) * gamma + beta       # BatchNorm2d (eval)
        return jnp.maximum(y, 0.0)                                # ReLU

    h = cba(h, raw[0])
    li = 1
    for _ in range(bn):
        y = cba(h, raw[li]); li += 1
        y = cba(y, raw[li]); li += 1
        h = jnp.concatenate([h, y], axis=-1)
    c_out = h.shape[-1]
    return jnp.transpose(h.reshape(N, H, W, c_out), (0, 3, 1, 2))


if __name__ == "__main__":
    key = jax.random.PRNGKey(0)
    kx, kp = jax.random.split(key)

    N, Cin, H, W = 2, 4, 16, 16
    out_channels = (8, 8)
    bn = 2  # number of DensUnits

    x = jax.random.normal(kx, (N, Cin, H, W), jnp.float32)
    layers, c_out = layer_plan(Cin, out_channels, bn)
    raw = init_raw_params(kp, layers)
    w_slab, b_slab = fold_and_pack_params(raw, layers)

    # NOTE: at this demo shape the Pallas path is launch-overhead dominated;
    # it exists for large N*H*W.  We still run it once for correctness.
    y = densblock_pallas(x, w_slab, b_slab, layers, bn, c_out)
    y = jax.block_until_ready(y)

    y_ref = densblock_ref(x, raw, bn)
    assert y.shape == (N, c_out, H, W), y.shape
    assert jnp.allclose(y, y_ref, atol=1e-4, rtol=1e-4), "mismatch vs reference"
    print("KERNEL_OK")
</pallas_src>

<mosaic_0001>
module attributes {stable_mosaic.version = 11 : i64} {
  func.func @kernel(%arg0: i32, %arg1: i32, %arg2: memref<1x4x256xf32, #tpu.memory_space<vmem>>, %arg3: memref<40x16xf32, #tpu.memory_space<vmem>>, %arg4: memref<40x1xf32, #tpu.memory_space<vmem>>, %arg5: memref<1x24x256xf32, #tpu.memory_space<vmem>>) attributes {dimension_semantics = [#tpu.dimension_semantics<parallel>, #tpu.dimension_semantics<parallel>], iteration_bounds = array<i64: 2, 1>, scalar_prefetch = 0 : i64, scratch_operands = 0 : i64, tpu.core_type = #tpu.core_type<tc>, window_params = [{transform_indices = @transform_0, window_bounds = array<i64: 1, 4, 256>}, {pipeline_mode = #tpu.pipeline_mode<synchronous>, transform_indices = @transform_1, window_bounds = array<i64: 40, 16>}, {pipeline_mode = #tpu.pipeline_mode<synchronous>, transform_indices = @transform_2, window_bounds = array<i64: 40, 1>}, {transform_indices = @transform_3, window_bounds = array<i64: 1, 24, 256>}]} {
    %c0 = arith.constant 0 : index
    %c0_0 = arith.constant 0 : index
    %c0_1 = arith.constant 0 : index
    %0 = vector.load %arg2[%c0, %c0_0, %c0_1] : memref<1x4x256xf32, #tpu.memory_space<vmem>>, vector<1x4x256xf32>
    %1 = vector.shape_cast %0 : vector<1x4x256xf32> to vector<4x256xf32>
    %c0_2 = arith.constant 0 : index
    %c0_3 = arith.constant 0 : index
    %2 = vector.load %arg4[%c0_2, %c0_3] : memref<40x1xf32, #tpu.memory_space<vmem>>, vector<8x1xf32>
    %3 = vector.shape_cast %2 : vector<8x1xf32> to vector<8x1xf32>
    %4 = vector.broadcast %3 : vector<8x1xf32> to vector<8x256xf32>
    %c0_4 = arith.constant 0 : index
    %c0_5 = arith.constant 0 : index
    %5 = vector.load %arg3[%c0_4, %c0_5] : memref<40x16xf32, #tpu.memory_space<vmem>>, vector<8x1xf32>
    %6 = vector.extract_strided_slice %1 {offsets = [0, 0], sizes = [1, 256], strides = [1, 1]} : vector<4x256xf32> to vector<1x256xf32>
    %7 = vector.broadcast %5 : vector<8x1xf32> to vector<8x256xf32>
    %8 = vector.broadcast %6 : vector<1x256xf32> to vector<8x256xf32>
    %9 = arith.mulf %7, %8 : vector<8x256xf32>
    %10 = arith.addf %4, %9 : vector<8x256xf32>
    %c0_6 = arith.constant 0 : index
    %c1 = arith.constant 1 : index
    %11 = vector.load %arg3[%c0_6, %c1] : memref<40x16xf32, #tpu.memory_space<vmem>>, vector<8x1xf32>
    %12 = vector.extract_strided_slice %1 {offsets = [1, 0], sizes = [1, 256], strides = [1, 1]} : vector<4x256xf32> to vector<1x256xf32>
    %13 = vector.broadcast %11 : vector<8x1xf32> to vector<8x256xf32>
    %14 = vector.broadcast %12 : vector<1x256xf32> to vector<8x256xf32>
    %15 = arith.mulf %13, %14 : vector<8x256xf32>
    %16 = arith.addf %10, %15 : vector<8x256xf32>
    %c0_7 = arith.constant 0 : index
    %c2 = arith.constant 2 : index
    %17 = vector.load %arg3[%c0_7, %c2] : memref<40x16xf32, #tpu.memory_space<vmem>>, vector<8x1xf32>
    %18 = vector.extract_strided_slice %1 {offsets = [2, 0], sizes = [1, 256], strides = [1, 1]} : vector<4x256xf32> to vector<1x256xf32>
    %19 = vector.broadcast %17 : vector<8x1xf32> to vector<8x256xf32>
    %20 = vector.broadcast %18 : vector<1x256xf32> to vector<8x256xf32>
    %21 = arith.mulf %19, %20 : vector<8x256xf32>
    %22 = arith.addf %16, %21 : vector<8x256xf32>
    %c0_8 = arith.constant 0 : index
    %c3 = arith.constant 3 : index
    %23 = vector.load %arg3[%c0_8, %c3] : memref<40x16xf32, #tpu.memory_space<vmem>>, vector<8x1xf32>
    %24 = vector.extract_strided_slice %1 {offsets = [3, 0], sizes = [1, 256], strides = [1, 1]} : vector<4x256xf32> to vector<1x256xf32>
    %25 = vector.broadcast %23 : vector<8x1xf32> to vector<8x256xf32>
    %26 = vector.broadcast %24 : vector<1x256xf32> to vector<8x256xf32>
    %27 = arith.mulf %25, %26 : vector<8x256xf32>
    %28 = arith.addf %22, %27 : vector<8x256xf32>
    %cst = arith.constant 0.000000e+00 : f32
    %29 = vector.broadcast %cst : f32 to vector<8x256xf32>
    %30 = arith.maximumf %28, %29 : vector<8x256xf32>
    %c8 = arith.constant 8 : index
    %c0_9 = arith.constant 0 : index
    %31 = vector.load %arg4[%c8, %c0_9] : memref<40x1xf32, #tpu.memory_space<vmem>>, vector<8x1xf32>
    %32 = vector.shape_cast %31 : vector<8x1xf32> to vector<8x1xf32>
    %33 = vector.broadcast %32 : vector<8x1xf32> to vector<8x256xf32>
    %c8_10 = arith.constant 8 : index
    %c0_11 = arith.constant 0 : index
    %34 = vector.load %arg3[%c8_10, %c0_11] : memref<40x16xf32, #tpu.memory_space<vmem>>, vector<8x1xf32>
    %35 = vector.extract_strided_slice %30 {offsets = [0, 0], sizes = [1, 256], strides = [1, 1]} : vector<8x256xf32> to vector<1x256xf32>
    %36 = vector.broadcast %34 : vector<8x1xf32> to vector<8x256xf32>
    %37 = vector.broadcast %35 : vector<1x256xf32> to vector<8x256xf32>
    %38 = arith.mulf %36, %37 : vector<8x256xf32>
    %39 = arith.addf %33, %38 : vector<8x256xf32>
    %c8_12 = arith.constant 8 : index
    %c1_13 = arith.constant 1 : index
    %40 = vector.load %arg3[%c8_12, %c1_13] : memref<40x16xf32, #tpu.memory_space<vmem>>, vector<8x1xf32>
    %41 = vector.extract_strided_slice %30 {offsets = [1, 0], sizes = [1, 256], strides = [1, 1]} : vector<8x256xf32> to vector<1x256xf32>
    %42 = vector.broadcast %40 : vector<8x1xf32> to vector<8x256xf32>
    %43 = vector.broadcast %41 : vector<1x256xf32> to vector<8x256xf32>
    %44 = arith.mulf %42, %43 : vector<8x256xf32>
    %45 = arith.addf %39, %44 : vector<8x256xf32>
    %c8_14 = arith.constant 8 : index
    %c2_15 = arith.constant 2 : index
    %46 = vector.load %arg3[%c8_14, %c2_15] : memref<40x16xf32, #tpu.memory_space<vmem>>, vector<8x1xf32>
    %47 = vector.extract_strided_slice %30 {offsets = [2, 0], sizes = [1, 256], strides = [1, 1]} : vector<8x256xf32> to vector<1x256xf32>
    %48 = vector.broadcast %46 : vector<8x1xf32> to vector<8x256xf32>
    %49 = vector.broadcast %47 : vector<1x256xf32> to vector<8x256xf32>
    %50 = arith.mulf %48, %49 : vector<8x256xf32>
    %51 = arith.addf %45, %50 : vector<8x256xf32>
    %c8_16 = arith.constant 8 : index
    %c3_17 = arith.constant 3 : index
    %52 = vector.load %arg3[%c8_16, %c3_17] : memref<40x16xf32, #tpu.memory_space<vmem>>, vector<8x1xf32>
    %53 = vector.extract_strided_slice %30 {offsets = [3, 0], sizes = [1, 256], strides = [1, 1]} : vector<8x256xf32> to vector<1x256xf32>
    %54 = vector.broadcast %52 : vector<8x1xf32> to vector<8x256xf32>
    %55 = vector.broadcast %53 : vector<1x256xf32> to vector<8x256xf32>
    %56 = arith.mulf %54, %55 : vector<8x256xf32>
    %57 = arith.addf %51, %56 : vector<8x256xf32>
    %c8_18 = arith.constant 8 : index
    %c4 = arith.constant 4 : index
    %58 = vector.load %arg3[%c8_18, %c4] : memref<40x16xf32, #tpu.memory_space<vmem>>, vector<8x1xf32>
    %59 = vector.extract_strided_slice %30 {offsets = [4, 0], sizes = [1, 256], strides = [1, 1]} : vector<8x256xf32> to vector<1x256xf32>
    %60 = vector.broadcast %58 : vector<8x1xf32> to vector<8x256xf32>
    %61 = vector.broadcast %59 : vector<1x256xf32> to vector<8x256xf32>
    %62 = arith.mulf %60, %61 : vector<8x256xf32>
    %63 = arith.addf %57, %62 : vector<8x256xf32>
    %c8_19 = arith.constant 8 : index
    %c5 = arith.constant 5 : index
    %64 = vector.load %arg3[%c8_19, %c5] : memref<40x16xf32, #tpu.memory_space<vmem>>, vector<8x1xf32>
    %65 = vector.extract_strided_slice %30 {offsets = [5, 0], sizes = [1, 256], strides = [1, 1]} : vector<8x256xf32> to vector<1x256xf32>
    %66 = vector.broadcast %64 : vector<8x1xf32> to vector<8x256xf32>
    %67 = vector.broadcast %65 : vector<1x256xf32> to vector<8x256xf32>
    %68 = arith.mulf %66, %67 : vector<8x256xf32>
    %69 = arith.addf %63, %68 : vector<8x256xf32>
    %c8_20 = arith.constant 8 : index
    %c6 = arith.constant 6 : index
    %70 = vector.load %arg3[%c8_20, %c6] : memref<40x16xf32, #tpu.memory_space<vmem>>, vector<8x1xf32>
    %71 = vector.extract_strided_slice %30 {offsets = [6, 0], sizes = [1, 256], strides = [1, 1]} : vector<8x256xf32> to vector<1x256xf32>
    %72 = vector.broadcast %70 : vector<8x1xf32> to vector<8x256xf32>
    %73 = vector.broadcast %71 : vector<1x256xf32> to vector<8x256xf32>
    %74 = arith.mulf %72, %73 : vector<8x256xf32>
    %75 = arith.addf %69, %74 : vector<8x256xf32>
    %c8_21 = arith.constant 8 : index
    %c7 = arith.constant 7 : index
    %76 = vector.load %arg3[%c8_21, %c7] : memref<40x16xf32, #tpu.memory_space<vmem>>, vector<8x1xf32>
    %77 = vector.extract_strided_slice %30 {offsets = [7, 0], sizes = [1, 256], strides = [1, 1]} : vector<8x256xf32> to vector<1x256xf32>
    %78 = vector.broadcast %76 : vector<8x1xf32> to vector<8x256xf32>
    %79 = vector.broadcast %77 : vector<1x256xf32> to vector<8x256xf32>
    %80 = arith.mulf %78, %79 : vector<8x256xf32>
    %81 = arith.addf %75, %80 : vector<8x256xf32>
    %cst_22 = arith.constant 0.000000e+00 : f32
    %82 = vector.broadcast %cst_22 : f32 to vector<8x256xf32>
    %83 = arith.maximumf %81, %82 : vector<8x256xf32>
    %c16 = arith.constant 16 : index
    %c0_23 = arith.constant 0 : index
    %84 = vector.load %arg4[%c16, %c0_23] : memref<40x1xf32, #tpu.memory_space<vmem>>, vector<8x1xf32>
    %85 = vector.shape_cast %84 : vector<8x1xf32> to vector<8x1xf32>
    %86 = vector.broadcast %85 : vector<8x1xf32> to vector<8x256xf32>
    %c16_24 = arith.constant 16 : index
    %c0_25 = arith.constant 0 : index
    %87 = vector.load %arg3[%c16_24, %c0_25] : memref<40x16xf32, #tpu.memory_space<vmem>>, vector<8x1xf32>
    %88 = vector.extract_strided_slice %83 {offsets = [0, 0], sizes = [1, 256], strides = [1, 1]} : vector<8x256xf32> to vector<1x256xf32>
    %89 = vector.broadcast %87 : vector<8x1xf32> to vector<8x256xf32>
    %90 = vector.broadcast %88 : vector<1x256xf32> to vector<8x256xf32>
    %91 = arith.mulf %89, %90 : vector<8x256xf32>
    %92 = arith.addf %86, %91 : vector<8x256xf32>
    %c16_26 = arith.constant 16 : index
    %c1_27 = arith.constant 1 : index
    %93 = vector.load %arg3[%c16_26, %c1_27] : memref<40x16xf32, #tpu.memory_space<vmem>>, vector<8x1xf32>
    %94 = vector.extract_strided_slice %83 {offsets = [1, 0], sizes = [1, 256], strides = [1, 1]} : vector<8x256xf32> to vector<1x256xf32>
    %95 = vector.broadcast %93 : vector<8x1xf32> to vector<8x256xf32>
    %96 = vector.broadcast %94 : vector<1x256xf32> to vector<8x256xf32>
    %97 = arith.mulf %95, %96 : vector<8x256xf32>
    %98 = arith.addf %92, %97 : vector<8x256xf32>
    %c16_28 = arith.constant 16 : index
    %c2_29 = arith.constant 2 : index
    %99 = vector.load %arg3[%c16_28, %c2_29] : memref<40x16xf32, #tpu.memory_space<vmem>>, vector<8x1xf32>
    %100 = vector.extract_strided_slice %83 {offsets = [2, 0], sizes = [1, 256], strides = [1, 1]} : vector<8x256xf32> to vector<1x256xf32>
    %101 = vector.broadcast %99 : vector<8x1xf32> to vector<8x256xf32>
    %102 = vector.broadcast %100 : vector<1x256xf32> to vector<8x256xf32>
    %103 = arith.mulf %101, %102 : vector<8x256xf32>
    %104 = arith.addf %98, %103 : vector<8x256xf32>
    %c16_30 = arith.constant 16 : index
    %c3_31 = arith.constant 3 : index
    %105 = vector.load %arg3[%c16_30, %c3_31] : memref<40x16xf32, #tpu.memory_space<vmem>>, vector<8x1xf32>
    %106 = vector.extract_strided_slice %83 {offsets = [3, 0], sizes = [1, 256], strides = [1, 1]} : vector<8x256xf32> to vector<1x256xf32>
    %107 = vector.broadcast %105 : vector<8x1xf32> to vector<8x256xf32>
    %108 = vector.broadcast %106 : vector<1x256xf32> to vector<8x256xf32>
    %109 = arith.mulf %107, %108 : vector<8x256xf32>
    %110 = arith.addf %104, %109 : vector<8x256xf32>
    %c16_32 = arith.constant 16 : index
    %c4_33 = arith.constant 4 : index
    %111 = vector.load %arg3[%c16_32, %c4_33] : memref<40x16xf32, #tpu.memory_space<vmem>>, vector<8x1xf32>
    %112 = vector.extract_strided_slice %83 {offsets = [4, 0], sizes = [1, 256], strides = [1, 1]} : vector<8x256xf32> to vector<1x256xf32>
    %113 = vector.broadcast %111 : vector<8x1xf32> to vector<8x256xf32>
    %114 = vector.broadcast %112 : vector<1x256xf32> to vector<8x256xf32>
    %115 = arith.mulf %113, %114 : vector<8x256xf32>
    %116 = arith.addf %110, %115 : vector<8x256xf32>
    %c16_34 = arith.constant 16 : index
    %c5_35 = arith.constant 5 : index
    %117 = vector.load %arg3[%c16_34, %c5_35] : memref<40x16xf32, #tpu.memory_space<vmem>>, vector<8x1xf32>
    %118 = vector.extract_strided_slice %83 {offsets = [5, 0], sizes = [1, 256], strides = [1, 1]} : vector<8x256xf32> to vector<1x256xf32>
    %119 = vector.broadcast %117 : vector<8x1xf32> to vector<8x256xf32>
    %120 = vector.broadcast %118 : vector<1x256xf32> to vector<8x256xf32>
    %121 = arith.mulf %119, %120 : vector<8x256xf32>
    %122 = arith.addf %116, %121 : vector<8x256xf32>
    %c16_36 = arith.constant 16 : index
    %c6_37 = arith.constant 6 : index
    %123 = vector.load %arg3[%c16_36, %c6_37] : memref<40x16xf32, #tpu.memory_space<vmem>>, vector<8x1xf32>
    %124 = vector.extract_strided_slice %83 {offsets = [6, 0], sizes = [1, 256], strides = [1, 1]} : vector<8x256xf32> to vector<1x256xf32>
    %125 = vector.broadcast %123 : vector<8x1xf32> to vector<8x256xf32>
    %126 = vector.broadcast %124 : vector<1x256xf32> to vector<8x256xf32>
    %127 = arith.mulf %125, %126 : vector<8x256xf32>
    %128 = arith.addf %122, %127 : vector<8x256xf32>
    %c16_38 = arith.constant 16 : index
    %c7_39 = arith.constant 7 : index
    %129 = vector.load %arg3[%c16_38, %c7_39] : memref<40x16xf32, #tpu.memory_space<vmem>>, vector<8x1xf32>
    %130 = vector.extract_strided_slice %83 {offsets = [7, 0], sizes = [1, 256], strides = [1, 1]} : vector<8x256xf32> to vector<1x256xf32>
    %131 = vector.broadcast %129 : vector<8x1xf32> to vector<8x256xf32>
    %132 = vector.broadcast %130 : vector<1x256xf32> to vector<8x256xf32>
    %133 = arith.mulf %131, %132 : vector<8x256xf32>
    %134 = arith.addf %128, %133 : vector<8x256xf32>
    %cst_40 = arith.constant 0.000000e+00 : f32
    %135 = vector.broadcast %cst_40 : f32 to vector<8x256xf32>
    %136 = arith.maximumf %134, %135 : vector<8x256xf32>
    %137 = tpu.concatenate %30, %136 in 0 : vector<8x256xf32>, vector<8x256xf32> -> vector<16x256xf32>
    %c24 = arith.constant 24 : index
    %c0_41 = arith.constant 0 : index
    %138 = vector.load %arg4[%c24, %c0_41] : memref<40x1xf32, #tpu.memory_space<vmem>>, vector<8x1xf32>
    %c24_42 = arith.constant 24 : index
    %c0_43 = arith.constant 0 : index
    %139 = vector.load %arg3[%c24_42, %c0_43] : memref<40x16xf32, #tpu.memory_space<vmem>>, vector<8x16xf32>
    %cst_44 = arith.constant dense<0.000000e+00> : vector<8x256xf32>
    %140 = tpu.matmul %139, %137, %cst_44 {dimension_numbers = #tpu.dot_dimension_numbers<[1], [0], [0], [1], [0, 0, 1, 1], [], []>} : vector<8x16xf32>, vector<16x256xf32>, vector<8x256xf32> -> vector<8x256xf32>
    %141 = vector.broadcast %138 : vector<8x1xf32> to vector<8x256xf32>
    %142 = arith.addf %140, %141 : vector<8x256xf32>
    %cst_45 = arith.constant 0.000000e+00 : f32
    %143 = vector.broadcast %cst_45 : f32 to vector<8x256xf32>
    %144 = arith.maximumf %142, %143 : vector<8x256xf32>
    %c32 = arith.constant 32 : index
    %c0_46 = arith.constant 0 : index
    %145 = vector.load %arg4[%c32, %c0_46] : memref<40x1xf32, #tpu.memory_space<vmem>>, vector<8x1xf32>
    %146 = vector.shape_cast %145 : vector<8x1xf32> to vector<8x1xf32>
    %147 = vector.broadcast %146 : vector<8x1xf32> to vector<8x256xf32>
    %c32_47 = arith.constant 32 : index
    %c0_48 = arith.constant 0 : index
    %148 = vector.load %arg3[%c32_47, %c0_48] : memref<40x16xf32, #tpu.memory_space<vmem>>, vector<8x1xf32>
    %149 = vector.extract_strided_slice %144 {offsets = [0, 0], sizes = [1, 256], strides = [1, 1]} : vector<8x256xf32> to vector<1x256xf32>
    %150 = vector.broadcast %148 : vector<8x1xf32> to vector<8x256xf32>
    %151 = vector.broadcast %149 : vector<1x256xf32> to vector<8x256xf32>
    %152 = arith.mulf %150, %151 : vector<8x256xf32>
    %153 = arith.addf %147, %152 : vector<8x256xf32>
    %c32_49 = arith.constant 32 : index
    %c1_50 = arith.constant 1 : index
    %154 = vector.load %arg3[%c32_49, %c1_50] : memref<40x16xf32, #tpu.memory_space<vmem>>, vector<8x1xf32>
    %155 = vector.extract_strided_slice %144 {offsets = [1, 0], sizes = [1, 256], strides = [1, 1]} : vector<8x256xf32> to vector<1x256xf32>
    %156 = vector.broadcast %154 : vector<8x1xf32> to vector<8x256xf32>
    %157 = vector.broadcast %155 : vector<1x256xf32> to vector<8x256xf32>
    %158 = arith.mulf %156, %157 : vector<8x256xf32>
    %159 = arith.addf %153, %158 : vector<8x256xf32>
    %c32_51 = arith.constant 32 : index
    %c2_52 = arith.constant 2 : index
    %160 = vector.load %arg3[%c32_51, %c2_52] : memref<40x16xf32, #tpu.memory_space<vmem>>, vector<8x1xf32>
    %161 = vector.extract_strided_slice %144 {offsets = [2, 0], sizes = [1, 256], strides = [1, 1]} : vector<8x256xf32> to vector<1x256xf32>
    %162 = vector.broadcast %160 : vector<8x1xf32> to vector<8x256xf32>
    %163 = vector.broadcast %161 : vector<1x256xf32> to vector<8x256xf32>
    %164 = arith.mulf %162, %163 : vector<8x256xf32>
    %165 = arith.addf %159, %164 : vector<8x256xf32>
    %c32_53 = arith.constant 32 : index
    %c3_54 = arith.constant 3 : index
    %166 = vector.load %arg3[%c32_53, %c3_54] : memref<40x16xf32, #tpu.memory_space<vmem>>, vector<8x1xf32>
    %167 = vector.extract_strided_slice %144 {offsets = [3, 0], sizes = [1, 256], strides = [1, 1]} : vector<8x256xf32> to vector<1x256xf32>
    %168 = vector.broadcast %166 : vector<8x1xf32> to vector<8x256xf32>
    %169 = vector.broadcast %167 : vector<1x256xf32> to vector<8x256xf32>
    %170 = arith.mulf %168, %169 : vector<8x256xf32>
    %171 = arith.addf %165, %170 : vector<8x256xf32>
    %c32_55 = arith.constant 32 : index
    %c4_56 = arith.constant 4 : index
    %172 = vector.load %arg3[%c32_55, %c4_56] : memref<40x16xf32, #tpu.memory_space<vmem>>, vector<8x1xf32>
    %173 = vector.extract_strided_slice %144 {offsets = [4, 0], sizes = [1, 256], strides = [1, 1]} : vector<8x256xf32> to vector<1x256xf32>
    %174 = vector.broadcast %172 : vector<8x1xf32> to vector<8x256xf32>
    %175 = vector.broadcast %173 : vector<1x256xf32> to vector<8x256xf32>
    %176 = arith.mulf %174, %175 : vector<8x256xf32>
    %177 = arith.addf %171, %176 : vector<8x256xf32>
    %c32_57 = arith.constant 32 : index
    %c5_58 = arith.constant 5 : index
    %178 = vector.load %arg3[%c32_57, %c5_58] : memref<40x16xf32, #tpu.memory_space<vmem>>, vector<8x1xf32>
    %179 = vector.extract_strided_slice %144 {offsets = [5, 0], sizes = [1, 256], strides = [1, 1]} : vector<8x256xf32> to vector<1x256xf32>
    %180 = vector.broadcast %178 : vector<8x1xf32> to vector<8x256xf32>
    %181 = vector.broadcast %179 : vector<1x256xf32> to vector<8x256xf32>
    %182 = arith.mulf %180, %181 : vector<8x256xf32>
    %183 = arith.addf %177, %182 : vector<8x256xf32>
    %c32_59 = arith.constant 32 : index
    %c6_60 = arith.constant 6 : index
    %184 = vector.load %arg3[%c32_59, %c6_60] : memref<40x16xf32, #tpu.memory_space<vmem>>, vector<8x1xf32>
    %185 = vector.extract_strided_slice %144 {offsets = [6, 0], sizes = [1, 256], strides = [1, 1]} : vector<8x256xf32> to vector<1x256xf32>
    %186 = vector.broadcast %184 : vector<8x1xf32> to vector<8x256xf32>
    %187 = vector.broadcast %185 : vector<1x256xf32> to vector<8x256xf32>
    %188 = arith.mulf %186, %187 : vector<8x256xf32>
    %189 = arith.addf %183, %188 : vector<8x256xf32>
    %c32_61 = arith.constant 32 : index
    %c7_62 = arith.constant 7 : index
    %190 = vector.load %arg3[%c32_61, %c7_62] : memref<40x16xf32, #tpu.memory_space<vmem>>, vector<8x1xf32>
    %191 = vector.extract_strided_slice %144 {offsets = [7, 0], sizes = [1, 256], strides = [1, 1]} : vector<8x256xf32> to vector<1x256xf32>
    %192 = vector.broadcast %190 : vector<8x1xf32> to vector<8x256xf32>
    %193 = vector.broadcast %191 : vector<1x256xf32> to vector<8x256xf32>
    %194 = arith.mulf %192, %193 : vector<8x256xf32>
    %195 = arith.addf %189, %194 : vector<8x256xf32>
    %cst_63 = arith.constant 0.000000e+00 : f32
    %196 = vector.broadcast %cst_63 : f32 to vector<8x256xf32>
    %197 = arith.maximumf %195, %196 : vector<8x256xf32>
    %198 = tpu.concatenate %30, %136, %197 in 0 : vector<8x256xf32>, vector<8x256xf32>, vector<8x256xf32> -> vector<24x256xf32>
    %c0_64 = arith.constant 0 : index
    %c0_65 = arith.constant 0 : index
    %c0_66 = arith.constant 0 : index
    %199 = vector.load %arg5[%c0_64, %c0_65, %c0_66] : memref<1x24x256xf32, #tpu.memory_space<vmem>>, vector<1x24x256xf32>
    %200 = vector.shape_cast %199 : vector<1x24x256xf32> to vector<24x256xf32>
    %201 = vector.shape_cast %198 : vector<24x256xf32> to vector<1x24x256xf32>
    tpu.vector_store %arg5[%c0_64, %c0_65, %c0_66], %201 {strides = array<i32>} : memref<1x24x256xf32, #tpu.memory_space<vmem>>, vector<1x24x256xf32>,
    return
  }
  func.func @transform_0(%arg0: i32, %arg1: i32) -> (i32, i32, i32) {
    %c0_i32 = arith.constant 0 : i32
    %c0_i32_0 = arith.constant 0 : i32
    return %arg0, %c0_i32, %arg1 : i32, i32, i32
  }
  func.func @transform_1(%arg0: i32, %arg1: i32) -> (i32, i32) {
    %c0_i32 = arith.constant 0 : i32
    %c0_i32_0 = arith.constant 0 : i32
    %c0_i32_1 = arith.constant 0 : i32
    return %c0_i32, %c0_i32_0 : i32, i32
  }
  func.func @transform_2(%arg0: i32, %arg1: i32) -> (i32, i32) {
    %c0_i32 = arith.constant 0 : i32
    %c0_i32_0 = arith.constant 0 : i32
    %c0_i32_1 = arith.constant 0 : i32
    return %c0_i32, %c0_i32_0 : i32, i32
  }
  func.func @transform_3(%arg0: i32, %arg1: i32) -> (i32, i32, i32) {
    %c0_i32 = arith.constant 0 : i32
    %c0_i32_0 = arith.constant 0 : i32
    return %arg0, %c0_i32, %arg1 : i32, i32, i32
  }
}

</mosaic_0001>

<bundles_post_ra>
// kernel: tpu_custom_call.1
= control target key start
LH: loop header
LB: loop body
LE: loop exit
PB: predicated region body
PF: predicated region fallthrough
CT: control target
= control target key end

     0   :  { %8 = vsyncpa [#allocation3], 0  ;;  %s1404_s0 = inlined_call_operand.vmem [shape: f32[2,4,256], index: 0, kind: input, shape index: {}]   ;;  %s1405_s1 = inlined_call_operand.vmem [shape: f32[40,16], index: 1, kind: input, shape index: {}]   ;;  %s1406_s2 = inlined_call_operand.vmem [shape: f32[40,1], index: 2, kind: input, shape index: {}]   ;;  %s1407_s3 = inlined_call_operand.hbm [shape: f32[2,24,256], index: 3, kind: output, shape index: {}]  }
   0x1   :  { %10 = vsyncpa [#allocation3 + $0x1], 0  ;;  %s1135_s12 = smov 0   ;;  %s1137_s13 = smov 0  }
   0x2   :  { %s1139_s14 = smov 0   ;;  %s1141_s15 = smov 0  }
   0x3   :  { %s1143_s16 = smov 0   ;;  %s1145_s17 = smov 0  }
   0x4 LB: > { %s915_s18 = sadd.s32 4294967295, %s1101_s17   ;;  %s916_s19 = sadd.s32 4294967294, %s1101_s17   ;;  %s1101_s17 = sphi %s1145_s17, %s16_s17   ;;  %s1097_s16 = sphi %s1143_s16, %s1414_s16   ;;  %s1093_s15 = sphi %s1141_s15, %s1413_s15   ;;  %s1089_s14 = sphi %s1139_s14, %s1412_s14   ;;  %s1085_s13 = sphi %s1137_s13, %s1411_s13   ;;  %s1081_s12 = sphi %s1135_s12, %s1410_s12  }
   0x5   : > { %s28_s20 = sadd.s32 1, %s1097_s16  ;;  %s107_s21 = sadd.s32 1, %s1089_s14 }
   0x6   : > { %p30_p0 = scmp.ge.s32.totalorder %s28_s20, 2  ;;  %p117_p1 = scmp.ne.s32.totalorder %s1089_s14, %s1085_s13 }
   0x7   : > { %p118_p2 = scmp.eq.s32.totalorder %s915_s18, 1  ;;  %p123_p3 = scmp.ne.s32.totalorder %s1085_s13, %s1081_s12 }
   0x8   : > { %s1416_s20 = smov (%p30_p0, %s28_s20), 0  ;;  %p124_p5 = scmp.eq.s32.totalorder %s916_s19, 1 }
   0x9   : > { %p1175_p4 = por %p118_p2, %p117_p1  ;;  %s102_s23 = ssub.s32 %s1097_s16, %s1416_s20 }
   0xa   : > { %p919_p6 = scmp.ge.s32.totalorder %s1101_s17, 1  ;;  %p105_p7 = scmp.eq.s32.totalorder %s102_s23, 0 }
   0xb   : > { %p1182_p8 = por %p124_p5, %p123_p3  ;;  %p161_p9 = scmp.lt.s32.totalorder %s1101_s17, 3 }
   0xc   : > { %s1188_s25 = scalar_select %p105_p7, %s1089_s14, %s107_s21  }
   0xd   : > { %p162_p10 = pnand %p919_p6, %p161_p9 }
   0xe   : > { %p190_p11 = scmp.lt.s32.totalorder (!%p162_p10), %s1093_s15, 1  ;;  %s186_s5 = sand.u32 (!%p162_p10), 1, %s1085_s13  }
   0xf   : > { %165 = sbr.rel (%p162_p10) target bundleno = 456 (0x1c8), region = 32  ;;  %s1359_s23 = scalar_lea.sflag (!%p162_p10), [#allocation3], %s186_s5 }
  0x10   : > { %s927_s6 = smul.u32 (!%p162_p10), 48, %s186_s5 }
  0x11   : > { %s928_s11 = smul.u32 (!%p162_p10), 768, %s1093_s15 }
  0x12   : > { %s1277_s7 = scalar_lea.vmem (!%p162_p10), [#allocation2], %s927_s6 }
  0x13   : > { %s836_s10 = sshll.u32 (!%p162_p10), %s1277_s7, 4  ;;  %s1354_s21 = scalar_lea.hbm (!%p162_p10), %s1407_s3, %s928_s11  ;;  %s1349_s10 = int_to_ptr.vmem [resolvable:$true] %s836_s10 }
  0x14   : > { %v207_v0 = vld [vmem:[%s1405_s1] sm:$0xff]  ;;  %v1103_v1 = vmov 1   ;;  %v1104_v2 = vmov 0   ;;  %v1105_v4 = vmov 2   ;;  %v322_v5 = vld [vmem:[%s1405_s1 + $0x8] sm:$0xff]  ;;  %v1106_v6 = vmov 3  }
  0x15   : > { %996 = vset.pattern.permute.xlu1 %v1103_v1  ;;  %995 = vset.pattern.permute.xlu0 %v1104_v2  ;;  %v201_v3 = vld [vmem:[%s1406_s2] sm:$0xff]  ;;  %v316_v7 = vld [vmem:[%s1406_s2 + $0x8] sm:$0xff]  ;;  %v1107_v8 = vmov 4   ;;  %v1108_v9 = vmov 7   ;;  %v460_v10 = vld [vmem:[%s1405_s1 + $0x10] sm:$0xff]  ;;  %v1109_v11 = vmov 5   ;;  %v214_v18 = vlaneseq }
  0x16   : > { %237 = vperm.xlu1 %996, %v207_v0   ;;  %210 = vperm.xlu0 %995, %v207_v0   ;;  %v1110_v12 = vmov 6   ;;  %v454_v13 = vld [vmem:[%s1406_s2 + $0x10] sm:$0xff]  ;;  %v1111_v14 = vmov 0.0   ;;  %v592_v15 = vld [vmem:[%s1406_s2 + $0x18] sm:$0xff]  ;;  %v676_v16 = vld [vmem:[%s1406_s2 + $0x20] sm:$0xff]  ;;  %s191_s27 = scalar_select %p190_p11, %s1093_s15, 1 }
  0x17   : > { %667 = vmatprep.mubr.f32.mxu0 %v1111_v14  ;;  %v682_v17 = vld [vmem:[%s1405_s1 + $0x20] sm:$0xff]  ;;  %v215_v19 = vshrl.u32 %v214_v18, 7  ;;  %vm599_vm0 = vcmask 130048   ;;  %s1025_s26 = scalar_lea.vmem %s1349_s10, 768  ;;  %s1112_s15 = smov [#allocation2]  }
  0x18   : > { %s926_s28 = sshll.u32 %s191_s27, 3  ;;  %p1026_p12 = scmp.ne.s32.totalorder %s1349_s10, %s1025_s26 }
  0x19   : > { %s197_s4 = scalar_lea.vmem %s1404_s0, %s926_s28  ;;  %v1230_v20 = vsub.s32 0, %v215_v19  ;;  %v1232_v21 = vsub.s32 4, %v215_v19  ;;  %v1234_v23 = vsub.s32 1, %v215_v19  ;;  %v1236_v24 = vsub.s32 5, %v215_v19  ;;  %s1029_s27 = sshll.u32 %s1112_s15, 4  ;;  %s1030_s27 = int_to_ptr.vmem [resolvable:$false] %s1029_s27 }
  0x1a   : > { %997 = vset.pattern.permute.xlu1 %v1105_v4  ;;  %204 = vperm.xlu0 %995, %v201_v3   ;;  %v200_v22 = vld [vmem:[%s197_s4] sm:$0xff]  ;;  %v1240_v27 = vsub.s32 2, %v215_v19  ;;  %v1242_v28 = vsub.s32 6, %v215_v19  ;;  %v1250_v35 = vsub.s32 3, %v215_v19  ;;  %v1252_v36 = vsub.s32 7, %v215_v19  ;;  %p1027_p13 = pnand %p1026_p12, %p1175_p4  ;;  %s1031_s28 = scalar_lea.vmem %s1030_s27, 1536 }
  0x1b   : > { %263 = vperm.xlu1 %997, %v207_v0   ;;  %v217_v25 = vrot.slane %v200_v22, %v1230_v20  ;;  %v221_v26 = vrot.slane %v200_v22, %v1232_v21  ;;  %v243_v29 = vrot.slane %v200_v22, %v1234_v23  ;;  %v247_v30 = vrot.slane %v200_v22, %v1236_v24  ;;  %p1032_p1 = scmp.lt.s32.totalorder %s1349_s10, %s1030_s27  ;;  %p1033_p2 = scmp.lt.s32.totalorder %s1031_s28, %s1025_s26 }
  0x1c   : > { %v269_v33 = vrot.slane %v200_v22, %v1240_v27  ;;  %v273_v34 = vrot.slane %v200_v22, %v1242_v28  ;;  %v295_v45 = vrot.slane %v200_v22, %v1250_v35  ;;  %v299_v46 = vrot.slane %v200_v22, %v1252_v36  ;;  %p1028_p0 = pneg %p1027_p13 }
  0x1d   : > { %v227_v31 = vrot.slane %v217_v25, %v1230_v20  ;;  %v231_v32 = vrot.slane %v221_v26, %v1230_v20  ;;  %v253_v39 = vrot.slane %v243_v29, %v1234_v23  ;;  %v257_v40 = vrot.slane %v247_v30, %v1234_v23  ;;  %p1034_p3 = por %p1033_p2, %p1032_p1 }
  0x1e   : > { %998 = vset.pattern.permute.xlu0 %v1106_v6  ;;  %v279_v43 = vrot.slane %v269_v33, %v1240_v27  ;;  %v283_v44 = vrot.slane %v273_v34, %v1240_v27  ;;  %v305_v55 = vrot.slane %v295_v45, %v1250_v35  ;;  %v309_v56 = vrot.slane %v299_v46, %v1250_v35 }
  0x1f   : > { %999 = vset.pattern.permute.xlu1 %v1104_v2  ;;  %289 = vperm.xlu0 %998, %v207_v0   ;;  %p1035_p5 = pnand %p1034_p3, %p1028_p0 }
  0x20   : > { %325 = vperm.xlu1 %999, %v322_v5  }
  0x23   : > { %1000 = vset.pattern.permute.xlu0 %v1103_v1 }
  0x24   : > { %319 = vperm.xlu1 %999, %v316_v7   ;;  %341 = vperm.xlu0 %1000, %v322_v5  }
  0x28   : > { %1001 = vset.pattern.permute.xlu1 %v1105_v4  ;;  %1003 = vset.pattern.permute.xlu0 %v1107_v8 }
  0x29   : > { %357 = vperm.xlu1 %1001, %v322_v5   ;;  %389 = vperm.xlu0 %1003, %v322_v5  }
  0x2d   : > { %1002 = vset.pattern.permute.xlu1 %v1106_v6  ;;  %1006 = vset.pattern.permute.xlu0 %v1108_v9 }
  0x2e   : > { %373 = vperm.xlu1 %1002, %v322_v5   ;;  %437 = vperm.xlu0 %1006, %v322_v5  }
  0x32   : > { %1004 = vset.pattern.permute.xlu1 %v1109_v11  ;;  %1008 = vset.pattern.permute.xlu0 %v1103_v1 }
  0x33   : > { %405 = vperm.xlu1 %1004, %v322_v5   ;;  %479 = vperm.xlu0 %1008, %v460_v10  }
  0x37   : > { %1005 = vset.pattern.permute.xlu1 %v1110_v12  ;;  %1011 = vset.pattern.permute.xlu0 %v1107_v8 }
  0x38   : > { %421 = vperm.xlu1 %1005, %v322_v5   ;;  %527 = vperm.xlu0 %1011, %v460_v10  }
  0x3c   : > { %1007 = vset.pattern.permute.xlu1 %v1104_v2  ;;  %1014 = vset.pattern.permute.xlu0 %v1108_v9 }
  0x3d   : > { %463 = vperm.xlu1 %1007, %v460_v10   ;;  %575 = vperm.xlu0 %1014, %v460_v10  }
  0x41   : > { %457 = vperm.xlu1 %1007, %v454_v13   ;;  %1016 = vset.pattern.permute.xlu0 %v1104_v2 }
  0x42   : > { %679 = vperm.xlu0 %1016, %v676_v16  }
  0x45   : > { %1009 = vset.pattern.permute.xlu1 %v1105_v4 }
  0x46   : > { %495 = vperm.xlu1 %1009, %v460_v10   ;;  %1019 = vset.pattern.permute.xlu0 %v1106_v6 }
  0x47   : > { %733 = vperm.xlu0 %1019, %v682_v17  }
  0x4a   : > { %1010 = vset.pattern.permute.xlu1 %v1106_v6 }
  0x4b   : > { %511 = vperm.xlu1 %1010, %v460_v10   ;;  %1022 = vset.pattern.permute.xlu0 %v1110_v12 }
  0x4c   : > { %781 = vperm.xlu0 %1022, %v682_v17  }
  0x4f   : > { %1012 = vset.pattern.permute.xlu1 %v1109_v11 }
  0x50   : > { %543 = vperm.xlu1 %1012, %v460_v10   ;;  %1024 = vset.pattern.permute.xlu0 %v1108_v9 }
  0x54   : > { %1013 = vset.pattern.permute.xlu1 %v1110_v12 }
  0x55   : > { %559 = vperm.xlu1 %1013, %v460_v10  }
  0x59   : > { %1015 = vset.pattern.permute.xlu1 %v1104_v2 }
  0x5a   : > { %596 = vperm.xlu1 %1015, %v592_v15  }
  0x5e   : > { %685 = vperm.xlu1 %1015, %v682_v17  }
  0x62   : > { %1017 = vset.pattern.permute.xlu1 %v1103_v1 }
  0x63   : > { %701 = vperm.xlu1 %1017, %v682_v17  }
  0x67   : > { %1018 = vset.pattern.permute.xlu1 %v1105_v4 }
  0x68   : > { %717 = vperm.xlu1 %1018, %v682_v17  }
  0x6c   : > { %1020 = vset.pattern.permute.xlu1 %v1107_v8 }
  0x6d   : > { %749 = vperm.xlu1 %1020, %v682_v17  }
  0x71   : > { %1021 = vset.pattern.permute.xlu1 %v1109_v11 }
  0x72   : > { %765 = vperm.xlu1 %1021, %v682_v17  }
  0x76   : > { %1023 = vset.pattern.permute.xlu1 %v1108_v9 }
  0x77   : > { %797 = vperm.xlu1 %1023, %v682_v17  }
  0x91   : > { %v238_v37 = vpop.permute.xlu1 %237  ;;  %v211_v38 = vpop.permute.xlu0 %210 }
  0x92   : > { %v232_v41 = vmul.f32 %v227_v31, %v211_v38  ;;  %v233_v42 = vmul.f32 %v231_v32, %v211_v38  ;;  %v258_v48 = vmul.f32 %v253_v39, %v238_v37  ;;  %v259_v49 = vmul.f32 %v257_v40, %v238_v37 }
  0x95   : > { %v205_v47 = vpop.permute.xlu0 %204 }
  0x96   : > { %v234_v50 = vadd.f32 %v232_v41, %v205_v47  ;;  %v235_v51 = vadd.f32 %v233_v42, %v205_v47  ;;  %v264_v52 = vpop.permute.xlu1 %263 }
  0x97   : > { %v284_v53 = vmul.f32 %v279_v43, %v264_v52  ;;  %v285_v54 = vmul.f32 %v283_v44, %v264_v52 }
  0x98   : > { %v260_v57 = vadd.f32 %v258_v48, %v234_v50  ;;  %v261_v58 = vadd.f32 %v259_v49, %v235_v51 }
  0x9a   : > { %v286_v59 = vadd.f32 %v284_v53, %v260_v57  ;;  %v287_v60 = vadd.f32 %v285_v54, %v261_v58  ;;  %v290_v61 = vpop.permute.xlu0 %289 }
  0x9b   : > { %v310_v62 = vmul.f32 %v305_v55, %v290_v61  ;;  %v311_v63 = vmul.f32 %v309_v56, %v290_v61  ;;  %v326_v0 = vpop.permute.xlu1 %325 }
  0x9d   : > { %v312_v1 = vadd.f32 %v310_v62, %v286_v59  ;;  %v313_v2 = vadd.f32 %v311_v63, %v287_v60 }
  0x9f   : > { %v1265_v3 = vmax.f32 %v312_v1, 0.0  ;;  %v1267_v4 = vmax.f32 %v313_v2, 0.0  ;;  %v320_v5 = vpop.permute.xlu1 %319  ;;  %v342_v12 = vpop.permute.xlu0 %341 }
  0xa1   : > { %v331_v6 = vrot.slane %v1265_v3, %v1230_v20  ;;  %v335_v7 = vrot.slane %v1267_v4, %v1230_v20  ;;  %v347_v8 = vrot.slane %v1265_v3, %v1234_v23  ;;  %v351_v9 = vrot.slane %v1267_v4, %v1234_v23  ;;  %814 = vst [vmem:[%s1277_s7] sm:$0xff] %v1265_v3 }
  0xa2   : > { %815 = vst [vmem:[%s1277_s7 + $0x8] sm:$0xff] %v1267_v4  ;;  %v363_v14 = vrot.slane %v1265_v3, %v1240_v27  ;;  %v367_v15 = vrot.slane %v1267_v4, %v1240_v27  ;;  %v379_v30 = vrot.slane %v1265_v3, %v1250_v35  ;;  %v383_v31 = vrot.slane %v1267_v4, %v1250_v35 }
  0xa3   : > { %v336_v10 = vmul.f32 %v331_v6, %v326_v0  ;;  %v337_v11 = vmul.f32 %v335_v7, %v326_v0  ;;  %v352_v18 = vmul.f32 %v347_v8, %v342_v12  ;;  %v353_v19 = vmul.f32 %v351_v9, %v342_v12 }
  0xa4   : > { %v358_v13 = vpop.permute.xlu1 %357  ;;  %v390_v39 = vpop.permute.xlu0 %389  ;;  %v395_v40 = vrot.slane %v1265_v3, %v1232_v21  ;;  %v399_v41 = vrot.slane %v1267_v4, %v1232_v21  ;;  %v411_v47 = vrot.slane %v1265_v3, %v1236_v24  ;;  %v415_v48 = vrot.slane %v1267_v4, %v1236_v24 }
  0xa5   : > { %v338_v16 = vadd.f32 %v336_v10, %v320_v5  ;;  %v339_v17 = vadd.f32 %v337_v11, %v320_v5  ;;  %v368_v26 = vmul.f32 %v363_v14, %v358_v13  ;;  %v369_v29 = vmul.f32 %v367_v15, %v358_v13 }
  0xa6   : > { %v400_v44 = vmul.f32 %v395_v40, %v390_v39  ;;  %v401_v45 = vmul.f32 %v399_v41, %v390_v39  ;;  %v427_v53 = vrot.slane %v1265_v3, %v1242_v28  ;;  %v431_v54 = vrot.slane %v1267_v4, %v1242_v28 }
  0xa7   : > { %v354_v22 = vadd.f32 %v352_v18, %v338_v16  ;;  %v355_v25 = vadd.f32 %v353_v19, %v339_v17  ;;  %v443_v56 = vrot.slane %v1265_v3, %v1252_v36  ;;  %v447_v57 = vrot.slane %v1267_v4, %v1252_v36 }
  0xa9   : > { %v370_v32 = vadd.f32 %v368_v26, %v354_v22  ;;  %v371_v33 = vadd.f32 %v369_v29, %v355_v25  ;;  %v374_v34 = vpop.permute.xlu1 %373  ;;  %v438_v55 = vpop.permute.xlu0 %437 }
  0xaa   : > { %v384_v37 = vmul.f32 %v379_v30, %v374_v34  ;;  %v385_v38 = vmul.f32 %v383_v31, %v374_v34  ;;  %v448_v63 = vmul.f32 %v443_v56, %v438_v55  ;;  %v449_v0 = vmul.f32 %v447_v57, %v438_v55 }
  0xac   : > { %v386_v42 = vadd.f32 %v384_v37, %v370_v32  ;;  %v387_v43 = vadd.f32 %v385_v38, %v371_v33 }
  0xae   : > { %v406_v46 = vpop.permute.xlu1 %405  ;;  %v402_v49 = vadd.f32 %v400_v44, %v386_v42  ;;  %v403_v50 = vadd.f32 %v401_v45, %v387_v43  ;;  %v480_v17 = vpop.permute.xlu0 %479 }
  0xaf   : > { %v416_v51 = vmul.f32 %v411_v47, %v406_v46  ;;  %v417_v52 = vmul.f32 %v415_v48, %v406_v46 }
  0xb1   : > { %v418_v59 = vadd.f32 %v416_v51, %v402_v49  ;;  %v419_v60 = vadd.f32 %v417_v52, %v403_v50 }
  0xb3   : > { %v422_v58 = vpop.permute.xlu1 %421  ;;  %v528_v48 = vpop.permute.xlu0 %527 }
  0xb4   : > { %v432_v61 = vmul.f32 %v427_v53, %v422_v58  ;;  %v433_v62 = vmul.f32 %v431_v54, %v422_v58 }
  0xb6   : > { %v434_v1 = vadd.f32 %v432_v61, %v418_v59  ;;  %v435_v2 = vadd.f32 %v433_v62, %v419_v60 }
  0xb8   : > { %v450_v5 = vadd.f32 %v448_v63, %v434_v1  ;;  %v451_v6 = vadd.f32 %v449_v0, %v435_v2  ;;  %v464_v7 = vpop.permute.xlu1 %463  ;;  %v576_v62 = vpop.permute.xlu0 %575 }
  0xba   : > { %v452_v8 = vmax.f32 %v450_v5, 0.0  ;;  %v453_v9 = vmax.f32 %v451_v6, 0.0 }
  0xbc   : > { %v469_v10 = vrot.slane %v452_v8, %v1230_v20  ;;  %v473_v11 = vrot.slane %v453_v9, %v1230_v20  ;;  %v458_v12 = vpop.permute.xlu1 %457  ;;  %v485_v13 = vrot.slane %v452_v8, %v1234_v23  ;;  %v489_v14 = vrot.slane %v453_v9, %v1234_v23 }
  0xbd   : > { %v501_v29 = vrot.slane %v452_v8, %v1240_v27  ;;  %v505_v30 = vrot.slane %v453_v9, %v1240_v27  ;;  %v517_v37 = vrot.slane %v452_v8, %v1250_v35  ;;  %v521_v38 = vrot.slane %v453_v9, %v1250_v35 }
  0xbe   : > { %v474_v15 = vmul.f32 %v469_v10, %v464_v7  ;;  %v475_v16 = vmul.f32 %v473_v11, %v464_v7  ;;  %v490_v22 = vmul.f32 %v485_v13, %v480_v17  ;;  %v491_v25 = vmul.f32 %v489_v14, %v480_v17 }
  0xbf   : > { %v533_v39 = vrot.slane %v452_v8, %v1232_v21  ;;  %v537_v40 = vrot.slane %v453_v9, %v1232_v21  ;;  %v549_v52 = vrot.slane %v452_v8, %v1236_v24  ;;  %v553_v53 = vrot.slane %v453_v9, %v1236_v24 }
  0xc0   : > { %v476_v18 = vadd.f32 %v474_v15, %v458_v12  ;;  %v477_v19 = vadd.f32 %v475_v16, %v458_v12  ;;  %v581_v58 = vrot.slane %v452_v8, %v1252_v36  ;;  %v585_v59 = vrot.slane %v453_v9, %v1252_v36 }
  0xc1   : > { %v496_v26 = vpop.permute.xlu1 %495  ;;  %v538_v49 = vmul.f32 %v533_v39, %v528_v48  ;;  %v539_v50 = vmul.f32 %v537_v40, %v528_v48  ;;  %v565_v60 = vrot.slane %v452_v8, %v1242_v28  ;;  %v569_v61 = vrot.slane %v453_v9, %v1242_v28  ;;  %v593_v8 = vld [vmem:[%s1405_s1 + $0x18] sm:$0xff] }
  0xc2   : > { %v492_v31 = vadd.f32 %v490_v22, %v476_v18  ;;  %v493_v32 = vadd.f32 %v491_v25, %v477_v19  ;;  %v506_v33 = vmul.f32 %v501_v29, %v496_v26  ;;  %v507_v34 = vmul.f32 %v505_v30, %v496_v26  ;;  %v680_v30 = vpop.permute.xlu0 %679 }
  0xc3   : > { %v586_v6 = vmul.f32 %v581_v58, %v576_v62  ;;  %v587_v7 = vmul.f32 %v585_v59, %v576_v62 }
  0xc4   : > { %v508_v42 = vadd.f32 %v506_v33, %v492_v31  ;;  %v509_v43 = vadd.f32 %v507_v34, %v493_v32 }
  0xc6   : > { %v512_v41 = vpop.permute.xlu1 %511 }
  0xc7   : > { %v522_v44 = vmul.f32 %v517_v37, %v512_v41  ;;  %v523_v45 = vmul.f32 %v521_v38, %v512_v41 }
  0xc9   : > { %v524_v46 = vadd.f32 %v522_v44, %v508_v42  ;;  %v525_v47 = vadd.f32 %v523_v45, %v509_v43  ;;  %v734_v42 = vpop.permute.xlu0 %733 }
  0xcb   : > { %v544_v51 = vpop.permute.xlu1 %543  ;;  %v540_v54 = vadd.f32 %v538_v49, %v524_v46  ;;  %v541_v55 = vadd.f32 %v539_v50, %v525_v47 }
  0xcc   : > { %v554_v56 = vmul.f32 %v549_v52, %v544_v51  ;;  %v555_v57 = vmul.f32 %v553_v53, %v544_v51 }
  0xce   : > { %v556_v0 = vadd.f32 %v554_v56, %v540_v54  ;;  %v557_v1 = vadd.f32 %v555_v57, %v541_v55 }
  0xd0   : > { %v560_v63 = vpop.permute.xlu1 %559 }
  0xd1   : > { %v570_v2 = vmul.f32 %v565_v60, %v560_v63  ;;  %v571_v5 = vmul.f32 %v569_v61, %v560_v63  ;;  %v782_v60 = vpop.permute.xlu0 %781 }
  0xd3   : > { %v572_v10 = vadd.f32 %v570_v2, %v556_v0  ;;  %v573_v11 = vadd.f32 %v571_v5, %v557_v1 }
  0xd5   : > { %v589_v12 = vadd.f32 %v587_v7, %v573_v11  ;;  %v588_v13 = vadd.f32 %v586_v6, %v572_v10  ;;  %v597_v9 = vpop.permute.xlu1 %596 }
  0xd7   : > { %v591_v14 = vmax.f32 %v589_v12, 0.0  ;;  %v590_v15 = vmax.f32 %v588_v13, 0.0 }
  0xd9   : > { %631 = vmatprep.subr.mxu0 %v591_v14  ;;  %817 = vst [vmem:[%s1277_s7 + $0x18] sm:$0xff] %v591_v14  ;;  %816 = vst [vmem:[%s1277_s7 + $0x10] sm:$0xff] %v590_v15  ;;  %v686_v16 = vpop.permute.xlu1 %685 }
  0xda   : > { %632 = vmatpush1.msra.mxu0 %v590_v15 }
  0xdb   : > { %633 = vmatprep.subr.mxu0 %v1267_v4 }
  0xdc   : > { %634 = vmatpush1.msra.mxu0 %v1265_v3 }
  0xdd   : > { %922 = vmatmul.mubr.msk.f32.vlgmr.msra.gmra.mxu0 %vm599_vm0, %v593_v8 }
  0xde   : > { %v702_v17 = vpop.permute.xlu1 %701 }
  0xe3   : > { %v718_v18 = vpop.permute.xlu1 %717 }
  0xe8   : > { %v750_v33 = vpop.permute.xlu1 %749 }
  0xed   : > { %v766_v48 = vpop.permute.xlu1 %765 }
  0xf2   : > { %v798_v1 = vpop.permute.xlu1 %797 }
 0x19d   : > { %v669_v19 = vpop.f32.mrf.mxu0 }
 0x19e   : > { %v670_v22 = vadd.f32 %v669_v19, %v597_v9 }
 0x19f   : > { %v671_v25 = vpop.f32.mrf.mxu0 }
 0x1a0   : > { %v674_v26 = vmax.f32 %v670_v22, 0.0  ;;  %v672_v29 = vadd.f32 %v671_v25, %v597_v9 }
 0x1a2   : > { %v691_v31 = vrot.slane %v674_v26, %v1230_v20  ;;  %v707_v32 = vrot.slane %v674_v26, %v1234_v23  ;;  %v675_v34 = vmax.f32 %v672_v29, 0.0  ;;  %v723_v3 = vrot.slane %v674_v26, %v1240_v27 }
 0x1a3   : > { %v739_v37 = vrot.slane %v674_v26, %v1250_v35  ;;  %v755_v43 = vrot.slane %v674_v26, %v1232_v21  ;;  %v771_v49 = vrot.slane %v674_v26, %v1236_v24  ;;  %v787_v58 = vrot.slane %v674_v26, %v1242_v28 }
 0x1a4   : > { %v696_v4 = vmul.f32 %v691_v31, %v686_v16  ;;  %v712_v39 = vmul.f32 %v707_v32, %v702_v17  ;;  %v695_v40 = vrot.slane %v675_v34, %v1230_v20  ;;  %v711_v41 = vrot.slane %v675_v34, %v1234_v23 }
 0x1a5   : > { %v728_v45 = vmul.f32 %v723_v3, %v718_v18  ;;  %v727_v47 = vrot.slane %v675_v34, %v1240_v27  ;;  %v744_v50 = vmul.f32 %v739_v37, %v734_v42  ;;  %v743_v54 = vrot.slane %v675_v34, %v1250_v35 }
 0x1a6   : > { %v698_v38 = vadd.f32 %v696_v4, %v680_v30  ;;  %v697_v46 = vmul.f32 %v695_v40, %v686_v16  ;;  %v713_v53 = vmul.f32 %v711_v41, %v702_v17  ;;  %v760_v20 = vmul.f32 %v755_v43, %v750_v33 }
 0x1a7   : > { %v759_v23 = vrot.slane %v675_v34, %v1232_v21  ;;  %v729_v57 = vmul.f32 %v727_v47, %v718_v18  ;;  %v776_v59 = vmul.f32 %v771_v49, %v766_v48  ;;  %v803_v27 = vrot.slane %v674_v26, %v1252_v36 }
 0x1a8   : > { %v714_v44 = vadd.f32 %v712_v39, %v698_v38  ;;  %v699_v52 = vadd.f32 %v697_v46, %v680_v30  ;;  %v745_v63 = vmul.f32 %v743_v54, %v734_v42  ;;  %v775_v0 = vrot.slane %v675_v34, %v1236_v24 }
 0x1a9   : > { %v761_v35 = vmul.f32 %v759_v23, %v750_v33  ;;  %v791_v5 = vrot.slane %v675_v34, %v1242_v28  ;;  %v792_v6 = vmul.f32 %v787_v58, %v782_v60  ;;  %v807_v7 = vrot.slane %v675_v34, %v1252_v36 }
 0x1aa   : > { %v730_v51 = vadd.f32 %v728_v45, %v714_v44  ;;  %v715_v56 = vadd.f32 %v713_v53, %v699_v52  ;;  %v808_v10 = vmul.f32 %v803_v27, %v798_v1  ;;  %v777_v12 = vmul.f32 %v775_v0, %v766_v48 }
 0x1ab   : > { %v793_v15 = vmul.f32 %v791_v5, %v782_v60  ;;  %v809_v8 = vmul.f32 %v807_v7, %v798_v1 }
 0x1ac   : > { %v746_v55 = vadd.f32 %v744_v50, %v730_v51  ;;  %v731_v62 = vadd.f32 %v729_v57, %v715_v56 }
 0x1ae   : > { %v762_v61 = vadd.f32 %v760_v20, %v746_v55  ;;  %v747_v2 = vadd.f32 %v745_v63, %v731_v62 }
 0x1b0   : > { %v778_v21 = vadd.f32 %v776_v59, %v762_v61  ;;  %v763_v11 = vadd.f32 %v761_v35, %v747_v2 }
 0x1b2   : > { %v794_v13 = vadd.f32 %v792_v6, %v778_v21  ;;  %v779_v14 = vadd.f32 %v777_v12, %v763_v11 }
 0x1b4   : > { %v810_v24 = vadd.f32 %v808_v10, %v794_v13  ;;  %v795_v9 = vadd.f32 %v793_v15, %v779_v14 }
 0x1b6   : > { %v812_v16 = vmax.f32 %v810_v24, 0.0  ;;  %v811_v28 = vadd.f32 %v809_v8, %v795_v9 }
 0x1b8   : > { %818 = vst [vmem:[%s1277_s7 + $0x20] sm:$0xff] %v812_v16  ;;  %v813_v36 = vmax.f32 %v811_v28, 0.0 }
 0x1ba   : > { %819 = vst [vmem:[%s1277_s7 + $0x28] sm:$0xff] %v813_v36 }
 0x1bb   : > { %1038 = shalt.err (!%p1035_p5)
}
 0x1bc   : > { %s1039_s29 = scalar_lea.hbm %s1354_s21, 768  ;;  %s1043_s5 = scalar_lea.hbm %s1407_s3, 1536 }
 0x1bd   : > { %p1040_p6 = scmp.ne.s32.totalorder %s1354_s21, %s1039_s29  ;;  %p1044_p10 = scmp.lt.s32.totalorder %s1354_s21, %s1407_s3 }
 0x1be   : > { %p1045_p11 = scmp.lt.s32.totalorder %s1043_s5, %s1039_s29 }
 0x1bf   : > { %p1041_p7 = pnand %p1040_p6, %p1175_p4 }
 0x1c0   : > { %p1046_p12 = por %p1045_p11, %p1044_p10 }
 0x1c1   : > { %p1042_p9 = pneg %p1041_p7 }
 0x1c3   : > { %p1047_p13 = pnand %p1046_p12, %p1042_p9 }
 0x1c5   : > { %1050 = shalt.err (!%p1047_p13)
}
 0x1c6   : > { %s1113_s8 = smov 256   ;;  %s1114_s9 = smov 16  }
 0x1c7   : > { %929 = dma.vmem_to_hbm [thread:$0]  (%p1175_p4), %s1349_s10, 768, %s1354_s21, %s1359_s23, %s1113_s8, %s1113_s8, %s1114_s9  }
 0x1c8 PF: > { %p935_p0 = scmp.ge.s32.totalorder %s1101_s17, 2  ;;  %s851_s11 = sand.u32 1, %s1081_s12  }
 0x1c9   : > { %s852_s18 = scalar_lea.sflag [#allocation3], %s851_s11 }
 0x1ca   : > { %p932_p1 = pnand %p935_p0, %p1182_p8 }
 0x1cc   : > { %p933_p2 = pneg %p932_p1 }
 0x1ce   : > { %1076 = dma.done.wait (%p933_p2), %s852_s18, 768  }
 0x1cf   : > { %1078 = vsyncadd (%p933_p2), %s852_s18, 4294966528  ;;  %s16_s17 = sadd.s32 1, %s1101_s17   ;;  %s1410_s12 = smov %s1085_s13 }
 0x1d0   : > { %p13_p3 = scmp.ge.s32.totalorder %s16_s17, 4   ;;  %s1411_s13 = smov %s1089_s14 }
 0x1d1   : > { %s1412_s14 = smov %s1188_s25  ;;  %s1413_s15 = smov %s1097_s16 }
 0x1d2   : > { %s1414_s16 = smov %s1416_s20  ;;  %15 = sbr.rel (!%p13_p3) target bundleno = 4 (0x4), region = 67 }
 0x1d7   :  { %857 = vsyncpa [#allocation3], 1 }
 0x1d8   :  { %859 = vsyncpa [#allocation3 + $0x1], 1 }

</bundles_post_ra>
